<compile_context>
chip_gen: v6e
topology: v6e:2x2x1
jax: 0.10.0
libtpu: 0.0.40
codegen_flags: <defaults>
</compile_context>

<pallas_src>
import functools
import math

import numpy as np
import jax
import jax.numpy as jnp
from jax import lax
from jax.experimental import pallas as pl
from jax.experimental.pallas import tpu as pltpu


# --------------------------------------------------------------------------------------
# Kernels
# --------------------------------------------------------------------------------------
def _pe_add_kernel(x_ref, pe_ref, o_ref):
    """Eval-mode forward: out = x + pe.

    x_ref  : VMEM (B, TS, D)
    pe_ref : VMEM (TS, D)   -- broadcasts over the batch dim in one VPU add
    o_ref  : VMEM (B, TS, D)
    """
    o_ref[...] = x_ref[...] + pe_ref[...]


# murmur3 fmix32 multipliers as signed int32 literals (wrapping int32 mul).
_MIX1 = -2048144789  # 0x85EBCA6B
_MIX2 = -1028477387  # 0xC2B2AE35


def _hash_keep_mask(shape, row0, seed, seq_len, d_model, keep_threshold):
    """Counter-based PRNG keep-mask (P(drop) = keep_threshold / 2^31).

    Pure int32 elementwise ops only (iota, xor, and, wrapping mul, arithmetic shift
    emulating a logical shift via masking) so it lowers identically under Mosaic and
    under CPU interpret mode.  The counter is the *global* element index, so the mask
    depends only on (seed, b, s, d) and not on the tile size.
    """
    b_idx = lax.broadcasted_iota(jnp.int32, shape, 0)
    r_idx = lax.broadcasted_iota(jnp.int32, shape, 1) + row0
    d_idx = lax.broadcasted_iota(jnp.int32, shape, 2)
    idx = (b_idx * seq_len + r_idx) * d_model + d_idx

    h = idx ^ seed
    h = (h ^ ((h >> 16) & 0xFFFF)) * _MIX1      # (h >>> 16)
    h = (h ^ ((h >> 13) & 0x7FFFF)) * _MIX2     # (h >>> 13)
    h = h ^ ((h >> 16) & 0xFFFF)                # (h >>> 16)
    return (h & 0x7FFFFFFF) >= keep_threshold


def _pe_add_dropout_kernel(seed_ref, x_ref, pe_ref, o_ref, *,
                           keep_threshold, inv_keep, seq_len, d_model):
    """Train-mode forward: out = inverted_dropout(x + pe).

    seed_ref : SMEM (1,) int32 scalar-prefetch operand (runtime seed -> no recompiles)
    """
    val = x_ref[...] + pe_ref[...]
    row0 = pl.program_id(0) * x_ref.shape[1]
    keep = _hash_keep_mask(x_ref.shape, row0, seed_ref[0], seq_len, d_model,
                           keep_threshold)
    o_ref[...] = jnp.where(keep, val * inv_keep, 0.0).astype(o_ref.dtype)


# --------------------------------------------------------------------------------------
# Wrapper
# --------------------------------------------------------------------------------------
def make_sinusoidal_pe(max_len, d_model, dtype=jnp.float32):
    """Exactly the table built in PositionalEncoding.__init__ (shape (max_len, d_model))."""
    assert d_model % 2 == 0, "sinusoidal PE requires an even d_model"
    position = np.arange(max_len, dtype=np.float32)[:, None]
    div_term = np.exp(
        np.arange(0, d_model, 2, dtype=np.float32) * -(math.log(10000.0) / d_model)
    )
    pe = np.zeros((max_len, d_model), dtype=np.float32)
    pe[:, 0::2] = np.sin(position * div_term)
    pe[:, 1::2] = np.cos(position * div_term)
    return jnp.asarray(pe, dtype=dtype)


def _pick_seq_block(batch, seq_len, d_model, itemsize, target_bytes=2 << 20):
    """Largest token tile such that one (B, ts, D) block is ~<= 2 MiB.

    Double-buffered x + out + pe blocks then total ~8-9 MiB, comfortably inside the
    default scoped VMEM on v5e (16 MiB) and v6e/v7x (32 MiB) -- no vmem_limit_bytes
    override needed.  Rows are rounded to the sublane packing factor of the dtype
    (8 for f32, 16 for bf16, 32 for int8/fp8) so loads/stores stay unmasked.
    """
    sub = 8 * max(1, 4 // max(1, itemsize))
    bytes_per_row = max(1, batch * d_model * itemsize)
    ts = target_bytes // bytes_per_row
    ts = max(sub, (ts // sub) * sub)
    if ts >= seq_len:
        return int(seq_len)
    return int(ts)


def positional_encoding_forward(x, pe, *, dropout_p=0.0, train=False, seed=0):
    """x: (B, S, D), pe: (max_len, D) -> (B, S, D); matches PositionalEncoding.forward."""
    B, S, D = x.shape
    assert pe.shape[1] == D and pe.shape[0] >= S, "pe table too small for this sequence"
    assert 0.0 <= dropout_p <= 1.0

    use_dropout = bool(train) and dropout_p > 0.0
    if use_dropout and dropout_p >= 1.0:
        return jnp.zeros_like(x)          # nn.Dropout(p=1.0) zeroes everything

    pe_slab = pe[:S].astype(x.dtype)

    # Lane-dense fold: for d_model < 128, fold k = 128 // D consecutive tokens into one
    # 128-wide lane row.  The op is purely elementwise and pe is reshaped identically,
    # so correspondence is exact; both reshapes are free (contiguous) layout changes.
    x_k, pe_k, S_k, D_k, folded = x, pe_slab, S, D, False
    if D < 128 and 128 % D == 0 and S % (128 // D) == 0:
        k = 128 // D
        S_k, D_k = S // k, k * D
        x_k = x.reshape(B, S_k, D_k)
        pe_k = pe_slab.reshape(S_k, D_k)
        folded = True

    ts = _pick_seq_block(B, S_k, D_k, x.dtype.itemsize)
    n_s = pl.cdiv(S_k, ts)                 # ragged tail handled by Pallas OOB masking

    common = dict(
        out_shape=jax.ShapeDtypeStruct((B, S_k, D_k), x.dtype),
        compiler_params=pltpu.CompilerParams(dimension_semantics=("parallel",)),
    )

    if not use_dropout:
        out = pl.pallas_call(
            _pe_add_kernel,
            grid_spec=pltpu.PrefetchScalarGridSpec(
                num_scalar_prefetch=0,
                grid=(n_s,),
                in_specs=[
                    pl.BlockSpec((B, ts, D_k), lambda s: (0, s, 0)),  # x block
                    pl.BlockSpec((ts, D_k), lambda s: (s, 0)),        # pe tile
                ],
                out_specs=pl.BlockSpec((B, ts, D_k), lambda s: (0, s, 0)),
            ),
            **common,
        )(x_k, pe_k)
    else:
        keep_threshold = min(int(round(dropout_p * float(1 << 31))), (1 << 31) - 1)
        kernel = functools.partial(
            _pe_add_dropout_kernel,
            keep_threshold=keep_threshold,
            inv_keep=1.0 / (1.0 - dropout_p),
            seq_len=S_k,
            d_model=D_k,
        )
        seed_arr = jnp.asarray(seed, dtype=jnp.int32).reshape((1,))
        out = pl.pallas_call(
            kernel,
            grid_spec=pltpu.PrefetchScalarGridSpec(
                num_scalar_prefetch=1,      # seed is a runtime scalar -> one compile
                grid=(n_s,),
                in_specs=[
                    pl.BlockSpec((B, ts, D_k), lambda s, seed_r: (0, s, 0)),
                    pl.BlockSpec((ts, D_k), lambda s, seed_r: (s, 0)),
                ],
                out_specs=pl.BlockSpec((B, ts, D_k), lambda s, seed_r: (0, s, 0)),
            ),
            **common,
        )(seed_arr, x_k, pe_k)

    return out.reshape(B, S, D) if folded else out


# --------------------------------------------------------------------------------------
# Demo / correctness check
# --------------------------------------------------------------------------------------
if __name__ == "__main__":
    B, S, D = 2, 8, 32
    max_len = 64
    dropout_p = 0.1

    key = jax.random.PRNGKey(0)
    x = jax.random.normal(key, (B, S, D), dtype=jnp.float32)
    pe = make_sinusoidal_pe(max_len, D)

    # --- eval mode (dropout = identity): exact check against pure-JAX reference ---
    out_eval = positional_encoding_forward(x, pe, dropout_p=dropout_p, train=False)
    out_eval = jax.block_until_ready(out_eval)
    ref = x + pe[:S][None, :, :]
    assert out_eval.shape == (B, S, D)
    assert jnp.allclose(out_eval, ref, atol=1e-6, rtol=1e-6)

    # --- train mode (in-kernel inverted dropout): structural checks ---
    out_tr = positional_encoding_forward(x, pe, dropout_p=dropout_p, train=True, seed=1234)
    out_tr = jax.block_until_ready(out_tr)
    assert out_tr.shape == (B, S, D)
    assert bool(jnp.all(jnp.isfinite(out_tr)))
    kept = out_tr != 0.0
    ref_scaled = ref * (1.0 / (1.0 - dropout_p))
    # Surviving elements must equal (x + pe) / (1 - p); dropped elements are exactly 0.
    assert jnp.allclose(out_tr, jnp.where(kept, ref_scaled, 0.0), atol=1e-5, rtol=1e-5)
    drop_frac = float(1.0 - jnp.mean(kept.astype(jnp.float32)))
    assert 0.0 <= drop_frac <= 0.5  # loose sanity bound for p=0.1 over B*S*D elements

    # Same seed -> same mask (single compiled kernel, runtime seed operand).
    out_tr2 = positional_encoding_forward(x, pe, dropout_p=dropout_p, train=True, seed=1234)
    assert jnp.array_equal(out_tr, jax.block_until_ready(out_tr2))

    print("KERNEL_OK")
</pallas_src>

<mosaic_0001>
module attributes {stable_mosaic.version = 11 : i64} {
  func.func @_pe_add_kernel(%arg0: i32, %arg1: memref<2x2x128xf32, #tpu.memory_space<vmem>>, %arg2: memref<2x128xf32, #tpu.memory_space<vmem>>, %arg3: memref<2x2x128xf32, #tpu.memory_space<vmem>>) attributes {dimension_semantics = [#tpu.dimension_semantics<parallel>], iteration_bounds = array<i64: 1>, scalar_prefetch = 0 : i64, scratch_operands = 0 : i64, tpu.core_type = #tpu.core_type<tc>, window_params = [{transform_indices = @transform_0, window_bounds = array<i64: 2, 2, 128>}, {transform_indices = @transform_1, window_bounds = array<i64: 2, 128>}, {transform_indices = @transform_2, window_bounds = array<i64: 2, 2, 128>}]} {
    %c0 = arith.constant 0 : index
    %c0_0 = arith.constant 0 : index
    %c0_1 = arith.constant 0 : index
    %0 = vector.load %arg1[%c0, %c0_0, %c0_1] : memref<2x2x128xf32, #tpu.memory_space<vmem>>, vector<2x2x128xf32>
    %c0_2 = arith.constant 0 : index
    %c0_3 = arith.constant 0 : index
    %1 = vector.load %arg2[%c0_2, %c0_3] : memref<2x128xf32, #tpu.memory_space<vmem>>, vector<2x128xf32>
    %2 = vector.shape_cast %1 : vector<2x128xf32> to vector<1x2x128xf32>
    %3 = vector.broadcast %2 : vector<1x2x128xf32> to vector<2x2x128xf32>
    %4 = arith.addf %0, %3 : vector<2x2x128xf32>
    %c0_4 = arith.constant 0 : index
    %c0_5 = arith.constant 0 : index
    %c0_6 = arith.constant 0 : index
    %5 = vector.load %arg3[%c0_4, %c0_5, %c0_6] : memref<2x2x128xf32, #tpu.memory_space<vmem>>, vector<2x2x128xf32>
    tpu.vector_store %arg3[%c0_4, %c0_5, %c0_6], %4 {strides = array<i32>} : memref<2x2x128xf32, #tpu.memory_space<vmem>>, vector<2x2x128xf32>,
    return
  }
  func.func @transform_0(%arg0: i32) -> (i32, i32, i32) {
    %c0_i32 = arith.constant 0 : i32
    %c0_i32_0 = arith.constant 0 : i32
    %c0_i32_1 = arith.constant 0 : i32
    return %c0_i32, %arg0, %c0_i32_0 : i32, i32, i32
  }
  func.func @transform_1(%arg0: i32) -> (i32, i32) {
    %c0_i32 = arith.constant 0 : i32
    %c0_i32_0 = arith.constant 0 : i32
    return %arg0, %c0_i32 : i32, i32
  }
  func.func @transform_2(%arg0: i32) -> (i32, i32, i32) {
    %c0_i32 = arith.constant 0 : i32
    %c0_i32_0 = arith.constant 0 : i32
    %c0_i32_1 = arith.constant 0 : i32
    return %c0_i32, %arg0, %c0_i32_0 : i32, i32, i32
  }
}

</mosaic_0001>

<bundles_post_ra>
// kernel: tpu_custom_call.1
= control target key start
LH: loop header
LB: loop body
LE: loop exit
PB: predicated region body
PF: predicated region fallthrough
CT: control target
= control target key end

     0   :  { %7 = vsyncpa [#allocation3], 0  ;;  %s169_s0 = inlined_call_operand.hbm [shape: f32[2,2,128], index: 0, kind: input, shape index: {}]   ;;  %s170_s1 = inlined_call_operand.hbm [shape: f32[2,128], index: 1, kind: input, shape index: {}]   ;;  %s171_s2 = inlined_call_operand.hbm [shape: f32[2,2,128], index: 2, kind: output, shape index: {}]  }
   0x1   :  { %8 = vsyncpa [#allocation6], 0 }
   0x2   :  { %9 = vsyncpa [#allocation4], 0  ;;  %s134_s9 = smov [#allocation2]  }
   0x3   :  { %s15_s10 = sshll.u32 %s134_s9, 4  ;;  %s16_s10 = int_to_ptr.vmem [resolvable:$true] %s15_s10 }
   0x4   :  { %s76_s11 = scalar_lea.vmem %s16_s10, 64  ;;  %p81_p1 = scmp.lt.s32.totalorder %s16_s10, %s16_s10 }
   0x5   :  { %p77_p0 = scmp.ne.s32.totalorder %s16_s10, %s76_s11  ;;  %p82_p2 = scmp.lt.s32.totalorder %s76_s11, %s76_s11 }
   0x7   :  { %p83_p3 = por %p82_p2, %p81_p1 }
   0x9   :  { %p84_p4 = pnand %p83_p3, %p77_p0 }
   0xb   :  { %87 = shalt.err (!%p84_p4)
}
   0xc   :  { %s135_s12 = smov 32   ;;  %s136_s13 = smov 2  }
   0xd   :  { %21 = dma.hbm_to_vmem [thread:$0]  %s169_s0, 64, %s16_s10, [#allocation3], %s135_s12, %s135_s12, %s136_s13  }
   0xe   :  { %s137_s16 = smov [#allocation5]  }
   0xf   :  { %s28_s17 = sshll.u32 %s137_s16, 4  ;;  %s29_s17 = int_to_ptr.vmem [resolvable:$true] %s28_s17 }
  0x10   :  { %s96_s18 = scalar_lea.vmem %s29_s17, 32  ;;  %p101_p6 = scmp.lt.s32.totalorder %s29_s17, %s29_s17 }
  0x11   :  { %p97_p5 = scmp.ne.s32.totalorder %s29_s17, %s96_s18  ;;  %p102_p7 = scmp.lt.s32.totalorder %s96_s18, %s96_s18 }
  0x13   :  { %p103_p8 = por %p102_p7, %p101_p6 }
  0x15   :  { %p104_p9 = pnand %p103_p8, %p97_p5 }
  0x17   :  { %107 = shalt.err (!%p104_p9)
}
  0x18   :  { %31 = dma.hbm_to_vmem [thread:$0]  %s170_s1, 32, %s29_s17, [#allocation6]  }
  0x19   :  { %128 = dma.done.wait [#allocation3], 64  }
  0x1a   :  { %129 = vsyncadd [#allocation3], 4294967232 }
  0x1b   :  { %130 = dma.done.wait [#allocation6], 32  }
  0x1c   :  { %131 = vsyncadd [#allocation6], 4294967264  ;;  %s138_s21 = smov [#allocation7]   ;;  %v38_v0 = vld [vmem:[#allocation2] sm:$0x3] }
  0x1d   :  { %s50_s0 = sshll.u32 %s138_s21, 4  ;;  %v40_v1 = vld [vmem:[#allocation5] sm:$0x3]  ;;  %v39_v2 = vld [vmem:[#allocation2 + $0x2] sm:$0x3]  ;;  %s51_s0 = int_to_ptr.vmem [resolvable:$true] %s50_s0 }
  0x1e   :  { %v41_v3 = vadd.f32 %v40_v1, %v38_v0  ;;  %v42_v4 = vadd.f32 %v40_v1, %v39_v2  ;;  %s108_s22 = scalar_lea.vmem %s51_s0, 64  ;;  %p113_p11 = scmp.lt.s32.totalorder %s51_s0, %s51_s0 }
  0x1f   :  { %p109_p10 = scmp.ne.s32.totalorder %s51_s0, %s108_s22  ;;  %p114_p12 = scmp.lt.s32.totalorder %s108_s22, %s108_s22 }
  0x20   :  { %43 = vst [vmem:[#allocation7] sm:$0x3] %v41_v3  ;;  %44 = vst [vmem:[#allocation7 + $0x2] sm:$0x3] %v42_v4 }
  0x21   :  { %p115_p13 = por %p114_p12, %p113_p11 }
  0x23   :  { %p116_p0 = pnand %p115_p13, %p109_p10 }
  0x25   :  { %119 = shalt.err (!%p116_p0)
}
  0x26   :  { %56 = dma.vmem_to_hbm [thread:$0]  %s51_s0, 64, %s171_s2, [#allocation4], %s135_s12, %s135_s12, %s136_s13  }
  0x27   :  { %132 = dma.done.wait [#allocation4], 64  }
  0x28   :  { %133 = vsyncadd [#allocation4], 4294967232 }
  0x29   :  { %60 = vsyncpa [#allocation3], 1 }
  0x2a   :  { %61 = vsyncpa [#allocation6], 1 }
  0x2b   :  { %62 = vsyncpa [#allocation4], 1 }

</bundles_post_ra>
